<compile_context>
chip_gen: v7x
topology: tpu7x:2x2x1
jax: 0.10.0
libtpu: 0.0.40
codegen_flags: <defaults>
</compile_context>

<pallas_src>
import math

import jax
import jax.numpy as jnp
import numpy as np
from jax.experimental import pallas as pl
from jax.experimental.pallas import tpu as pltpu


def _round_up(x, m):
    return ((x + m - 1) // m) * m


# --------------------------------------------------------------------------
# Kernel: per-tile LayerNorm (x_hat) followed by the folded head matmul.
# inv_h (1 / true hidden size) is baked in as a compile-time constant so that
# zero-padded hidden lanes do not perturb the LN statistics.
# --------------------------------------------------------------------------
def _make_ln_head_kernel(inv_h):
    def kernel(x_ref, w_ref, b_ref, o_ref):
        x = x_ref[...].astype(jnp.float32)                    # [TB, H_pad]
        s1 = jnp.sum(x, axis=-1, keepdims=True)               # padded lanes are 0
        s2 = jnp.sum(x * x, axis=-1, keepdims=True)
        mean = s1 * inv_h
        var = s2 * inv_h - mean * mean                        # biased, as torch LN
        x_hat = (x - mean) * jax.lax.rsqrt(var + 1e-5)        # [TB, H_pad]
        # gamma/beta are folded into w_ref / b_ref offline; padded H rows of
        # w_ref are zero, so garbage x_hat in padded lanes is annihilated.
        logits = jnp.dot(x_hat.astype(jnp.bfloat16), w_ref[...],
                         preferred_element_type=jnp.float32)  # [TB, C_pad] f32 acc
        o_ref[...] = (logits + b_ref[...]).astype(o_ref.dtype)
    return kernel


# --------------------------------------------------------------------------
# One-time parameter preparation (outside the hot path).
# --------------------------------------------------------------------------
def prepare_head_params(ln_gamma, ln_beta, head_w, head_b):
    """Fold LayerNorm affine into the head, pad H and C to multiples of 128.

    ln_gamma, ln_beta : [H]       LayerNorm scale / shift
    head_w            : [C, H]    torch nn.Linear weight layout
    head_b            : [C]
    Returns (w_pad [H_pad, C_pad] bf16, b_pad [1, C_pad] f32, H_true).
    """
    H = ln_gamma.shape[0]
    C = head_w.shape[0]
    H_pad = _round_up(H, 128)
    C_pad = _round_up(max(C, 128), 128)

    w_t = head_w.astype(jnp.float32).T                      # [H, C]
    w_fold = ln_gamma.astype(jnp.float32)[:, None] * w_t    # gamma folded in
    b_fold = ln_beta.astype(jnp.float32) @ w_t + head_b.astype(jnp.float32)

    # Zero-padded rows/lanes keep logits exact in the first num_classes lanes.
    w_pad = jnp.zeros((H_pad, C_pad), jnp.float32).at[:H, :C].set(w_fold)
    b_pad = jnp.zeros((1, C_pad), jnp.float32).at[0, :C].set(b_fold)
    return w_pad.astype(jnp.bfloat16), b_pad, H


def _choose_batch_tile(B, *, min_steps=4, max_tile=2048):
    """Pick a row tile that yields multiple grid steps (pipelining + megacore
    sharding) while staying a multiple of 8 and <= 2048 rows."""
    if B <= 8:
        return B
    target = -(-B // min_steps)                 # cdiv(B, min_steps)
    tb = _round_up(target, 8)
    return max(8, min(tb, max_tile))


# --------------------------------------------------------------------------
# Wrapper: batched head(final_ln(vnodes)).  Returns lane-dense padded logits
# [B, C_pad]; the consumer (loss/argmax) indexes [:, :num_classes].
# --------------------------------------------------------------------------
def dual_graphormer_head(vnodes, w_pad, b_pad, h_true, *, tb=None,
                         out_dtype=jnp.float32):
    """vnodes: [B, H or H_pad] (bf16 preferred); w_pad: [H_pad, C_pad] bf16;
    b_pad: [1, C_pad] f32."""
    B = vnodes.shape[0]
    H_pad, C_pad = w_pad.shape

    # Layout plumbing for the degenerate H < 128 case only; production hidden
    # sizes (e.g. 768) are 128-aligned and should be produced at H_pad by the
    # encoder so this pad is a no-op.
    if vnodes.shape[1] != H_pad:
        vnodes = jnp.pad(vnodes, ((0, 0), (0, H_pad - vnodes.shape[1])))

    if tb is None:
        tb = _choose_batch_tile(B)

    out = pl.pallas_call(
        _make_ln_head_kernel(1.0 / h_true),
        out_shape=jax.ShapeDtypeStruct((B, C_pad), out_dtype),
        grid=(pl.cdiv(B, tb),),
        in_specs=[
            # Streamed activations: the only HBM stream that scales with B.
            pl.BlockSpec((tb, H_pad), lambda i: (i, 0)),
            # VMEM-resident folded weight / bias: constant index_map, single
            # buffer (never re-fetched).
            pl.BlockSpec((H_pad, C_pad), lambda i: (0, 0),
                         pipeline_mode=pl.Buffered(1)),
            pl.BlockSpec((1, C_pad), lambda i: (0, 0),
                         pipeline_mode=pl.Buffered(1)),
        ],
        out_specs=pl.BlockSpec((tb, C_pad), lambda i: (i, 0)),
        compiler_params=pltpu.CompilerParams(
            dimension_semantics=("parallel",)),
    )(vnodes, w_pad, b_pad)
    return out          # [B, C_pad]; slice to num_classes in the consumer


# --------------------------------------------------------------------------
# Pure-JAX reference (un-folded LN + Linear, f32) for correctness checks.
# --------------------------------------------------------------------------
def _reference(vnodes, ln_gamma, ln_beta, head_w, head_b):
    x = vnodes.astype(jnp.float32)
    mean = jnp.mean(x, axis=-1, keepdims=True)
    var = jnp.mean((x - mean) ** 2, axis=-1, keepdims=True)
    normed = (x - mean) / jnp.sqrt(var + 1e-5) * ln_gamma + ln_beta
    return normed @ head_w.T + head_b


def _run_case(key, batch_size, hidden_size, num_classes, n_layers, tb=None):
    k_vn, k_w, k_g, k_bt = jax.random.split(key, 4)

    # Parameter shapes from the module __init__ (init values deterministic).
    ln_gamma = 1.0 + 0.1 * jax.random.normal(k_g, (hidden_size,), jnp.float32)
    ln_beta = 0.1 * jax.random.normal(k_bt, (hidden_size,), jnp.float32)
    head_w = (0.02 / math.sqrt(n_layers)) * jax.random.normal(
        k_w, (num_classes, hidden_size), jnp.float32)
    head_b = jnp.zeros((num_classes,), jnp.float32)

    # Stand-in for the per-graph virtual-node vector x[3][0][0].view(-1),
    # batched over graphs -> [B, H], streamed as bf16 (encoder output dtype).
    # TODO(synk): replace with real Node_Edge_Embedding / Encoder /
    # Switch_Layer outputs once their definitions are available.
    vnodes = jax.random.normal(k_vn, (batch_size, hidden_size),
                               jnp.float32).astype(jnp.bfloat16)

    # One-time parameter layout (fold + transpose + pad + bf16) — NOT per call.
    w_pad, b_pad, h_true = prepare_head_params(ln_gamma, ln_beta, head_w, head_b)

    out = dual_graphormer_head(vnodes, w_pad, b_pad, h_true, tb=tb)
    out = jax.block_until_ready(out)

    # Reference consumes the same bf16 activations (upcast) with f32 params;
    # remaining deltas are the offline fold order and bf16 MXU operands.
    ref = _reference(vnodes, ln_gamma, ln_beta, head_w, head_b)
    np.testing.assert_allclose(np.asarray(out)[:, :num_classes],
                               np.asarray(ref), rtol=3e-2, atol=3e-3)
    assert out.shape[0] == batch_size and out.shape[1] >= num_classes


if __name__ == "__main__":
    key = jax.random.PRNGKey(0)
    k1, k2 = jax.random.split(key)

    # 1) Module-consistent small shapes (batch=2, hidden=32, num_classes=8):
    #    exercises the H 32 -> 128 offline padding path.
    _run_case(k1, batch_size=2, hidden_size=32, num_classes=8, n_layers=6)

    # 2) Larger batch with the default tile chooser: B=64 -> tb=16, a 4-step
    #    pipelined grid, plus the 128-lane output padding path (C=10 -> 128).
    _run_case(k2, batch_size=64, hidden_size=256, num_classes=10, n_layers=6)

    print("KERNEL_OK")
</pallas_src>

<mosaic_0001>
module attributes {stable_mosaic.version = 11 : i64} {
  func.func @kernel(%arg0: i32, %arg1: memref<2x128xbf16, #tpu.memory_space<vmem>>, %arg2: memref<128x128xbf16, #tpu.memory_space<vmem>>, %arg3: memref<1x128xf32, #tpu.memory_space<vmem>>, %arg4: memref<2x128xf32, #tpu.memory_space<vmem>>) attributes {dimension_semantics = [#tpu.dimension_semantics<parallel>], iteration_bounds = array<i64: 1>, scalar_prefetch = 0 : i64, scratch_operands = 0 : i64, tpu.core_type = #tpu.core_type<tc>, window_params = [{transform_indices = @transform_0, window_bounds = array<i64: 2, 128>}, {pipeline_mode = #tpu.pipeline_mode<synchronous>, transform_indices = @transform_1, window_bounds = array<i64: 128, 128>}, {pipeline_mode = #tpu.pipeline_mode<synchronous>, transform_indices = @transform_2, window_bounds = array<i64: 1, 128>}, {transform_indices = @transform_3, window_bounds = array<i64: 2, 128>}]} {
    %c0 = arith.constant 0 : index
    %c0_0 = arith.constant 0 : index
    %0 = vector.load %arg1[%c0, %c0_0] : memref<2x128xbf16, #tpu.memory_space<vmem>>, vector<2x128xbf16>
    %1 = arith.extf %0 : vector<2x128xbf16> to vector<2x128xf32>
    %cst = arith.constant dense<0.000000e+00> : vector<2xf32>
    %2 = vector.multi_reduction <add>, %1, %cst [1] : vector<2x128xf32> to vector<2xf32>
    %3 = vector.shape_cast %2 : vector<2xf32> to vector<2x1xf32>
    %4 = arith.mulf %1, %1 : vector<2x128xf32>
    %cst_1 = arith.constant dense<0.000000e+00> : vector<2xf32>
    %5 = vector.multi_reduction <add>, %4, %cst_1 [1] : vector<2x128xf32> to vector<2xf32>
    %6 = vector.shape_cast %5 : vector<2xf32> to vector<2x1xf32>
    %cst_2 = arith.constant 3.125000e-02 : f32
    %7 = vector.broadcast %cst_2 : f32 to vector<2x1xf32>
    %8 = arith.mulf %3, %7 : vector<2x1xf32>
    %cst_3 = arith.constant 3.125000e-02 : f32
    %9 = vector.broadcast %cst_3 : f32 to vector<2x1xf32>
    %10 = arith.mulf %6, %9 : vector<2x1xf32>
    %11 = arith.mulf %8, %8 : vector<2x1xf32>
    %12 = arith.subf %10, %11 : vector<2x1xf32>
    %13 = vector.broadcast %8 : vector<2x1xf32> to vector<2x128xf32>
    %14 = arith.subf %1, %13 : vector<2x128xf32>
    %cst_4 = arith.constant 9.99999974E-6 : f32
    %15 = vector.broadcast %cst_4 : f32 to vector<2x1xf32>
    %16 = arith.addf %12, %15 : vector<2x1xf32>
    %17 = math.rsqrt %16 : vector<2x1xf32>
    %18 = vector.broadcast %17 : vector<2x1xf32> to vector<2x128xf32>
    %19 = arith.mulf %14, %18 : vector<2x128xf32>
    %20 = arith.truncf %19 : vector<2x128xf32> to vector<2x128xbf16>
    %c0_5 = arith.constant 0 : index
    %c0_6 = arith.constant 0 : index
    %21 = vector.load %arg2[%c0_5, %c0_6] : memref<128x128xbf16, #tpu.memory_space<vmem>>, vector<128x128xbf16>
    %cst_7 = arith.constant dense<0.000000e+00> : vector<2x128xf32>
    %22 = tpu.matmul %20, %21, %cst_7 {dimension_numbers = #tpu.dot_dimension_numbers<[1], [0], [0], [1], [0, 0, 1, 1], [], []>} : vector<2x128xbf16>, vector<128x128xbf16>, vector<2x128xf32> -> vector<2x128xf32>
    %c0_8 = arith.constant 0 : index
    %c0_9 = arith.constant 0 : index
    %23 = vector.load %arg3[%c0_8, %c0_9] : memref<1x128xf32, #tpu.memory_space<vmem>>, vector<1x128xf32>
    %24 = vector.broadcast %23 : vector<1x128xf32> to vector<2x128xf32>
    %25 = arith.addf %22, %24 : vector<2x128xf32>
    %c0_10 = arith.constant 0 : index
    %c0_11 = arith.constant 0 : index
    %26 = vector.load %arg4[%c0_10, %c0_11] : memref<2x128xf32, #tpu.memory_space<vmem>>, vector<2x128xf32>
    tpu.vector_store %arg4[%c0_10, %c0_11], %25 {strides = array<i32>} : memref<2x128xf32, #tpu.memory_space<vmem>>, vector<2x128xf32>,
    return
  }
  func.func @transform_0(%arg0: i32) -> (i32, i32) {
    %c0_i32 = arith.constant 0 : i32
    %c0_i32_0 = arith.constant 0 : i32
    return %arg0, %c0_i32 : i32, i32
  }
  func.func @transform_1(%arg0: i32) -> (i32, i32) {
    %c0_i32 = arith.constant 0 : i32
    %c0_i32_0 = arith.constant 0 : i32
    %c0_i32_1 = arith.constant 0 : i32
    return %c0_i32, %c0_i32_0 : i32, i32
  }
  func.func @transform_2(%arg0: i32) -> (i32, i32) {
    %c0_i32 = arith.constant 0 : i32
    %c0_i32_0 = arith.constant 0 : i32
    %c0_i32_1 = arith.constant 0 : i32
    return %c0_i32, %c0_i32_0 : i32, i32
  }
  func.func @transform_3(%arg0: i32) -> (i32, i32) {
    %c0_i32 = arith.constant 0 : i32
    %c0_i32_0 = arith.constant 0 : i32
    return %arg0, %c0_i32 : i32, i32
  }
}

</mosaic_0001>

<bundles_post_ra>
// kernel: tpu_custom_call.1
= control target key start
LH: loop header
LB: loop body
LE: loop exit
PB: predicated region body
PF: predicated region fallthrough
CT: control target
= control target key end

     0   :  { %8 = vsyncpa [#allocation3], 0  ;;  %s389_s0 = inlined_call_operand.hbm [shape: bf16[2,128], index: 0, kind: input, shape index: {}]   ;;  %s390_s1 = inlined_call_operand.hbm [shape: bf16[128,128], index: 1, kind: input, shape index: {}]   ;;  %s391_s2 = inlined_call_operand.vmem [shape: f32[1,128], index: 2, kind: input, shape index: {}]   ;;  %s392_s3 = inlined_call_operand.hbm [shape: f32[2,128], index: 3, kind: output, shape index: {}]  }
   0x1   :  { %9 = vsyncpa [#allocation6], 0 }
   0x2   :  { %10 = vsyncpa [#allocation4], 0  ;;  %s316_s12 = smov [#allocation2]   ;;  %s317_s14 = smov [#allocation5]  }
   0x3   :  { %s17_s13 = sshll.u32 %s316_s12, 4  ;;  %s26_s15 = sshll.u32 %s317_s14, 4  ;;  %s18_s13 = int_to_ptr.vmem [resolvable:$true] %s17_s13  ;;  %s343_s15 = int_to_ptr.vmem [resolvable:$true] %s26_s15 }
   0x4   :  { %s244_s18 = scalar_lea.hbm %s389_s0, 16 }
   0x5   :  { %p245_p0 = scmp.ne.s32.totalorder %s389_s0, %s244_s18  ;;  %p248_p1 = scmp.lt.u32.totalorder %s244_s18, %s389_s0 }
   0x7   :  { %p250_p2 = pnand %p248_p1, %p245_p0 }
   0x9   :  { %253 = shalt.err (!%p250_p2)
}
   0xa   :  { %s254_s23 = scalar_lea.vmem %s18_s13, 16  ;;  %s258_s24 = scalar_lea.vmem %s18_s13, 32 }
   0xb   :  { %p255_p3 = scmp.ne.s32.totalorder %s18_s13, %s254_s23  ;;  %p259_p4 = scmp.lt.s32.totalorder %s18_s13, %s18_s13 }
   0xc   :  { %p260_p5 = scmp.lt.s32.totalorder %s258_s24, %s254_s23 }
   0xe   :  { %p261_p6 = por %p260_p5, %p259_p4 }
  0x10   :  { %p262_p7 = pnand %p261_p6, %p255_p3 }
  0x12   :  { %265 = shalt.err (!%p262_p7)
}
  0x13   :  { %20 = dma.hbm_to_vmem [thread:$0]  %s389_s0, 16, %s18_s13, [#allocation3]  }
  0x14   :  { %s266_s29 = scalar_lea.hbm %s390_s1, 1024 }
  0x15   :  { %p267_p8 = scmp.ne.s32.totalorder %s390_s1, %s266_s29  ;;  %p270_p9 = scmp.lt.u32.totalorder %s266_s29, %s390_s1 }
  0x17   :  { %p272_p10 = pnand %p270_p9, %p267_p8 }
  0x19   :  { %275 = shalt.err (!%p272_p10)
}
  0x1a   :  { %s276_s7 = scalar_lea.vmem %s343_s15, 1024  ;;  %p281_p12 = scmp.lt.s32.totalorder %s343_s15, %s343_s15 }
  0x1b   :  { %p277_p11 = scmp.ne.s32.totalorder %s343_s15, %s276_s7  ;;  %p282_p13 = scmp.lt.s32.totalorder %s276_s7, %s276_s7 }
  0x1d   :  { %p283_p0 = por %p282_p13, %p281_p12 }
  0x1f   :  { %p284_p1 = pnand %p283_p0, %p277_p11 }
  0x21   :  { %287 = shalt.err (!%p284_p1)
}
  0x22   :  { %s318_s0 = smov 64   ;;  %s319_s8 = smov 4  }
  0x23   :  { %32 = dma.hbm_to_vmem [thread:$0]  %s390_s1, 1024, %s343_s15, [#allocation6], %s318_s0, %s318_s0, %s319_s8  }
  0x24   :  { %310 = dma.done.wait [#allocation3], 16  }
  0x25   :  { %311 = vsyncadd [#allocation3], 4294967280 }
  0x26   :  { %312 = dma.done.wait [#allocation6], 1024  }
  0x27   :  { %313 = vsyncadd [#allocation6], 4294966272  ;;  %v320_v0 = vmov 0.0   ;;  %vm44_vm0 = vcmask 1041408   ;;  %v42_v1 = vld [vmem:[#allocation2] sm:$0x1] }
  0x28   :  { %207 = vmatprep.subr.bf16.mxu0 %v320_v0  ;;  %v43_v2 = vunpack.c.l.bf16 %v42_v1  ;;  %v234_v3 = vld [vmem:[#allocation5] sm:$0xff]   ;;  %v235_v6 = vld [vmem:[#allocation5 + $0x8] sm:$0xff]   ;;  %v236_v8 = vld [vmem:[#allocation5 + $0x10] sm:$0xff]   ;;  %vm321_vm1 = vmmov 0   ;;  %s322_s12 = smov [#allocation7]  }
  0x29   :  { %208 = vmatpush3.bf16.msra.mxu0 %v234_v3  ;;  %v237_v9 = vld [vmem:[#allocation5 + $0x18] sm:$0xff]   ;;  %v238_v10 = vld [vmem:[#allocation5 + $0x20] sm:$0xff]   ;;  %v239_v11 = vld [vmem:[#allocation5 + $0x28] sm:$0xff]   ;;  %223 = vmatprep.mubr.msk.bf16.mxu0 %vm321_vm1, %v320_v0  ;;  %s179_s13 = sshll.u32 %s322_s12, 4  ;;  %s180_s13 = int_to_ptr.vmem [resolvable:$true] %s179_s13 }
  0x2a   :  { %v45_v4 = vsel %vm44_vm0, %v43_v2, 0.0  ;;  %v48_v5 = vmul.f32 %v43_v2, %v43_v2  ;;  %209 = vmatprep.subr.bf16.mxu0 %v320_v0  ;;  %v240_v12 = vld [vmem:[#allocation5 + $0x30] sm:$0xff]   ;;  %v241_v13 = vld [vmem:[#allocation5 + $0x38] sm:$0xff]   ;;  %s288_s14 = scalar_lea.vmem %s180_s13, 32  ;;  %p293_p3 = scmp.lt.s32.totalorder %s180_s13, %s180_s13 }
  0x2b   :  { %46 = vadd.xlane.f32.xlu0 %v45_v4  ;;  %v189_v25 = vld [vmem:[%s391_s2] ss:$0 sm:$0xff]  ;;  %p289_p2 = scmp.ne.s32.totalorder %s180_s13, %s288_s14  ;;  %p294_p4 = scmp.lt.s32.totalorder %s288_s14, %s288_s14 }
  0x2c   :  { %v49_v7 = vsel %vm44_vm0, %v48_v5, 0.0 }
  0x2d   :  { %210 = vmatpush3.bf16.msra.mxu0 %v235_v6  ;;  %p295_p5 = por %p294_p4, %p293_p3 }
  0x2e   :  { %211 = vmatprep.subr.bf16.mxu0 %v320_v0 }
  0x2f   :  { %50 = vadd.xlane.f32.xlu0 %v49_v7  ;;  %p296_p6 = pnand %p295_p5, %p289_p2 }
  0x31   :  { %212 = vmatpush3.bf16.msra.mxu0 %v236_v8 }
  0x32   :  { %213 = vmatprep.subr.bf16.mxu0 %v320_v0 }
  0x35   :  { %214 = vmatpush3.bf16.msra.mxu0 %v237_v9 }
  0x36   :  { %215 = vmatprep.subr.bf16.mxu0 %v320_v0 }
  0x39   :  { %216 = vmatpush3.bf16.msra.mxu0 %v238_v10 }
  0x3a   :  { %217 = vmatprep.subr.bf16.mxu0 %v320_v0 }
  0x3d   :  { %218 = vmatpush3.bf16.msra.mxu0 %v239_v11 }
  0x3e   :  { %219 = vmatprep.subr.bf16.mxu0 %v320_v0 }
  0x41   :  { %220 = vmatpush3.bf16.msra.mxu0 %v240_v12 }
  0x42   :  { %221 = vmatprep.subr.bf16.mxu0 %v320_v0 }
  0x45   :  { %222 = vmatpush3.bf16.msra.mxu0 %v241_v13 }
  0xb8   :  { %v47_v14 = vpop.xlane.xlu0 %46 }
  0xb9   :  { %v52_v15 = vmul.f32 0.03125, %v47_v14 }
  0xbb   :  { %v54_v17 = vmul.f32 %v52_v15, %v52_v15  ;;  %v56_v21 = vsub.f32 %v43_v2, %v52_v15 }
  0xbc   :  { %v51_v16 = vpop.xlane.xlu0 %50 }
  0xbd   :  { %v53_v18 = vmul.f32 0.03125, %v51_v16 }
  0xbf   :  { %v55_v19 = vsub.f32 %v53_v18, %v54_v17 }
  0xc1   :  { %v57_v20 = vadd.f32 1e-05, %v55_v19 }
  0xc3   :  { %242 = vrsqrt.f32 %v57_v20 }
  0xcd   :  { %v243_v22 = vpop.eup %242 }
  0xce   :  { %v59_v23 = vmul.f32 %v243_v22, %v56_v21 }
  0xd0   :  { %v60_v24 = vpack.c.bf16 %v59_v23, %v59_v23 }
  0xd2   :  { %224 = vmatmul.mubr.bf16.vlgmr.msra.gmra.mrb[0].mxu0 %v60_v24 }
 0x1a5   :  { %v166_v26 = vpop.f32.mrb[0].mxu0 }
 0x1a6   :  { %v167_v27 = vadd.f32 %v189_v25, %v166_v26  ;;  %v225_v28 = vpop.f32.mrb[1].mxu0 }
 0x1a7   :  { %v169_v29 = vpop.f32.mrb[2].mxu0 }
 0x1a8   :  { %172 = vst [vmem:[#allocation7] sm:$0x3] %v167_v27  ;;  %v226_v30 = vpop.f32.mrb[3].mxu0 }
 0x1a9   :  { %299 = shalt.err (!%p296_p6)
}
 0x1aa   :  { %s300_s2 = scalar_lea.hbm %s392_s3, 32 }
 0x1ab   :  { %p301_p7 = scmp.ne.s32.totalorder %s392_s3, %s300_s2  ;;  %p304_p8 = scmp.lt.u32.totalorder %s300_s2, %s392_s3 }
 0x1ad   :  { %p306_p9 = pnand %p304_p8, %p301_p7 }
 0x1af   :  { %309 = shalt.err (!%p306_p9)
}
 0x1b0   :  { %182 = dma.vmem_to_hbm [thread:$0]  %s180_s13, 32, %s392_s3, [#allocation4]  }
 0x1b1   :  { %314 = dma.done.wait [#allocation4], 32  }
 0x1b2   :  { %315 = vsyncadd [#allocation4], 4294967264 }
 0x1b3   :  { %186 = vsyncpa [#allocation3], 1 }
 0x1b4   :  { %187 = vsyncpa [#allocation6], 1 }
 0x1b5   :  { %188 = vsyncpa [#allocation4], 1 }

</bundles_post_ra>
